<compile_context>
chip_gen: v6e
topology: v6e:2x2x1
jax: 0.10.0
libtpu: 0.0.40
codegen_flags: <defaults>
</compile_context>

<pallas_src>
import functools

import jax
import jax.numpy as jnp
from jax.experimental import pallas as pl
from jax.experimental.pallas import tpu as pltpu


_NUM_SPLIT = 2    # leading "parallel" axis: 2 TensorCores on v7x, plain loop elsewhere
_TM_GEMM = 256    # M tile for the conv GEMM + stats pass
_TM_EW = 512      # M tile for the BN + LeakyReLU pass (pure HBM-bandwidth work)
_M_ALIGN = 512    # lcm(_NUM_SPLIT * _TM_GEMM, _TM_EW)


def _conv_stats_kernel(p_ref, w_ref, y_ref, sum_ref, ssq_ref):
    """Conv GEMM (bf16 operands, f32 accumulation) + per-core per-channel stats."""
    y = jnp.dot(p_ref[...], w_ref[...], preferred_element_type=jnp.float32)  # (tm, c_pad) f32
    y_ref[...] = y.astype(y_ref.dtype)

    @pl.when(pl.program_id(1) == 0)
    def _():
        sum_ref[...] = jnp.zeros_like(sum_ref)
        ssq_ref[...] = jnp.zeros_like(ssq_ref)

    # Accumulate into sublane row 0 of the resident (8, c_pad) per-core partial block;
    # rows 1..7 stay zero (zeroed above) so the glue can simply sum all rows.
    sum_ref[0:1, :] += jnp.sum(y, axis=0, keepdims=True)
    ssq_ref[0:1, :] += jnp.sum(y * y, axis=0, keepdims=True)


def _bn_lrelu_kernel(y_ref, scale_ref, shift_ref, o_ref):
    """Fused BN affine + LeakyReLU(0.1): math in f32, bf16 storage, in place over y."""
    z = y_ref[...].astype(jnp.float32) * scale_ref[...] + shift_ref[...]
    o_ref[...] = jnp.where(z >= 0.0, z, 0.1 * z).astype(o_ref.dtype)


def _im2col(x_nhwc, kh, kw, stride, padding):
    n, h, w, c = x_nhwc.shape
    xp = jnp.pad(x_nhwc, ((0, 0), (padding, padding), (padding, padding), (0, 0)))
    oh = (h + 2 * padding - kh) // stride + 1
    ow = (w + 2 * padding - kw) // stride + 1
    cols = []
    for dh in range(kh):
        for dw in range(kw):
            cols.append(
                xp[:, dh:dh + (oh - 1) * stride + 1:stride,
                      dw:dw + (ow - 1) * stride + 1:stride, :]
            )
    # (N, OH, OW, KH*KW, C) -> (N*OH*OW, KH*KW*C)   (tap-major, channel-minor)
    patches = jnp.stack(cols, axis=3).reshape(n * oh * ow, kh * kw * c)
    return patches, oh, ow


@functools.partial(jax.jit, static_argnames=("stride", "padding", "eps"))
def cnn_block(x_nchw, weight_oihw, gamma, beta, *, stride=1, padding=1, eps=1e-5):
    n, c_in, h, w = x_nchw.shape
    c_out, _, kh, kw = weight_oihw.shape

    # ---- layout glue (plain JAX): NCHW -> NHWC, bf16, im2col ----
    x_nhwc = jnp.transpose(x_nchw, (0, 2, 3, 1)).astype(jnp.bfloat16)
    patches, oh, ow = _im2col(x_nhwc, kh, kw, stride, padding)            # (M, K) bf16
    k = kh * kw * c_in
    w_mat = jnp.transpose(weight_oihw, (2, 3, 1, 0)).reshape(k, c_out)    # (K, C_out)

    # Lane-dense channel dim: pad C_out up to a multiple of 128 (zero weight columns
    # produce y == 0, scale*0 + 0 shift, sliced off at the end).
    c_pad = pl.cdiv(c_out, 128) * 128
    w_mat = jnp.pad(w_mat, ((0, 0), (0, c_pad - c_out))).astype(jnp.bfloat16)
    gamma_p = jnp.pad(gamma.astype(jnp.float32), (0, c_pad - c_out))
    beta_p = jnp.pad(beta.astype(jnp.float32), (0, c_pad - c_out))

    m_real = n * oh * ow
    m_pad = pl.cdiv(m_real, _M_ALIGN) * _M_ALIGN
    if m_pad != m_real:
        patches = jnp.pad(patches, ((0, m_pad - m_real), (0, 0)))   # zero rows: neutral for sums

    tiles_per_split = m_pad // (_NUM_SPLIT * _TM_GEMM)

    # ---- kernel 1: conv GEMM + per-channel sum / sum-of-squares (per-core partials) ----
    y, sum_part, ssq_part = pl.pallas_call(
        _conv_stats_kernel,
        out_shape=(
            jax.ShapeDtypeStruct((m_pad, c_pad), jnp.bfloat16),
            jax.ShapeDtypeStruct((_NUM_SPLIT * 8, c_pad), jnp.float32),
            jax.ShapeDtypeStruct((_NUM_SPLIT * 8, c_pad), jnp.float32),
        ),
        grid_spec=pltpu.PrefetchScalarGridSpec(
            num_scalar_prefetch=0,
            grid=(_NUM_SPLIT, tiles_per_split),
            in_specs=[
                pl.BlockSpec((_TM_GEMM, k), lambda c, i: (c * tiles_per_split + i, 0)),
                pl.BlockSpec((k, c_pad), lambda c, i: (0, 0)),
            ],
            out_specs=[
                pl.BlockSpec((_TM_GEMM, c_pad), lambda c, i: (c * tiles_per_split + i, 0)),
                pl.BlockSpec((8, c_pad), lambda c, i: (c, 0)),
                pl.BlockSpec((8, c_pad), lambda c, i: (c, 0)),
            ],
        ),
        compiler_params=pltpu.CompilerParams(
            dimension_semantics=("parallel", "arbitrary")),
    )(patches, w_mat)

    # ---- tiny glue: batch stats -> BN scale/shift (training-mode, biased variance) ----
    ch_sum = jnp.sum(sum_part, axis=0)                    # (c_pad,)
    ch_ssq = jnp.sum(ssq_part, axis=0)                    # (c_pad,)
    mean = ch_sum / m_real
    var = jnp.maximum(ch_ssq / m_real - mean * mean, 0.0)  # clamp guards f32 cancellation
    scale_v = gamma_p * jax.lax.rsqrt(var + eps)
    shift_v = beta_p - mean * scale_v
    scale = scale_v.reshape(1, c_pad)
    shift = shift_v.reshape(1, c_pad)

    # ---- kernel 2: fused BN affine + LeakyReLU, written in place over y ----
    out_flat = pl.pallas_call(
        _bn_lrelu_kernel,
        out_shape=jax.ShapeDtypeStruct((m_pad, c_pad), jnp.bfloat16),
        grid_spec=pltpu.PrefetchScalarGridSpec(
            num_scalar_prefetch=0,
            grid=(m_pad // _TM_EW,),
            in_specs=[
                pl.BlockSpec((_TM_EW, c_pad), lambda i: (i, 0)),
                pl.BlockSpec((1, c_pad), lambda i: (0, 0)),
                pl.BlockSpec((1, c_pad), lambda i: (0, 0)),
            ],
            out_specs=pl.BlockSpec((_TM_EW, c_pad), lambda i: (i, 0)),
        ),
        compiler_params=pltpu.CompilerParams(dimension_semantics=("parallel",)),
        input_output_aliases={0: 0},
    )(y, scale, shift)

    # ---- layout glue back to NCHW ----
    out = out_flat[:m_real, :c_out].reshape(n, oh, ow, c_out).astype(jnp.float32)
    return jnp.transpose(out, (0, 3, 1, 2))


def _reference(x_nchw, weight_oihw, gamma, beta, stride, padding, eps=1e-5):
    y = jax.lax.conv_general_dilated(
        x_nchw, weight_oihw,
        window_strides=(stride, stride),
        padding=[(padding, padding), (padding, padding)],
        dimension_numbers=("NCHW", "OIHW", "NCHW"),
    )
    mean = jnp.mean(y, axis=(0, 2, 3), keepdims=True)
    var = jnp.mean((y - mean) ** 2, axis=(0, 2, 3), keepdims=True)
    yn = (y - mean) * jax.lax.rsqrt(var + eps)
    yn = yn * gamma.reshape(1, -1, 1, 1) + beta.reshape(1, -1, 1, 1)
    return jnp.where(yn >= 0.0, yn, 0.1 * yn)


if __name__ == "__main__":
    key = jax.random.PRNGKey(0)
    kx, kw_key = jax.random.split(key)

    # CNNBlock(in_channels=4, out_channels=8, kernel_size=3, stride=1, padding=1)
    N, C_in, H, W = 2, 4, 16, 16
    C_out, KH, KW = 8, 3, 3
    stride, padding = 1, 1

    x = jax.random.normal(kx, (N, C_in, H, W), dtype=jnp.float32)
    weight = 0.1 * jax.random.normal(kw_key, (C_out, C_in, KH, KW), dtype=jnp.float32)
    gamma = 1.0 + 0.1 * jnp.arange(C_out, dtype=jnp.float32)
    beta = 0.05 * jnp.arange(C_out, dtype=jnp.float32)

    out = cnn_block(x, weight, gamma, beta, stride=stride, padding=padding)
    out = jax.block_until_ready(out)

    ref = _reference(x, weight, gamma, beta, stride, padding)
    assert out.shape == ref.shape, (out.shape, ref.shape)
    # bf16 GEMM operands + bf16 y/out storage -> compare at a bf16-appropriate tolerance.
    max_err = float(jnp.max(jnp.abs(out - ref)))
    assert jnp.allclose(out, ref, rtol=5e-2, atol=5e-2), max_err

    print("KERNEL_OK")
</pallas_src>

<mosaic_0001>
module attributes {stable_mosaic.version = 11 : i64} {
  func.func @_conv_stats_kernel(%arg0: i32, %arg1: i32, %arg2: memref<256x36xbf16, #tpu.memory_space<vmem>>, %arg3: memref<36x128xbf16, #tpu.memory_space<vmem>>, %arg4: memref<256x128xbf16, #tpu.memory_space<vmem>>, %arg5: memref<8x128xf32, #tpu.memory_space<vmem>>, %arg6: memref<8x128xf32, #tpu.memory_space<vmem>>) attributes {dimension_semantics = [#tpu.dimension_semantics<parallel>, #tpu.dimension_semantics<arbitrary>], iteration_bounds = array<i64: 2, 1>, scalar_prefetch = 0 : i64, scratch_operands = 0 : i64, tpu.core_type = #tpu.core_type<tc>, window_params = [{transform_indices = @transform_0, window_bounds = array<i64: 256, 36>}, {pipeline_mode = #tpu.pipeline_mode<synchronous>, transform_indices = @transform_1, window_bounds = array<i64: 36, 128>}, {transform_indices = @transform_2, window_bounds = array<i64: 256, 128>}, {transform_indices = @transform_3, window_bounds = array<i64: 8, 128>}, {transform_indices = @transform_4, window_bounds = array<i64: 8, 128>}]} {
    %c0 = arith.constant 0 : index
    %c0_0 = arith.constant 0 : index
    %0 = vector.load %arg2[%c0, %c0_0] : memref<256x36xbf16, #tpu.memory_space<vmem>>, vector<256x36xbf16>
    %c0_1 = arith.constant 0 : index
    %c0_2 = arith.constant 0 : index
    %1 = vector.load %arg3[%c0_1, %c0_2] : memref<36x128xbf16, #tpu.memory_space<vmem>>, vector<36x128xbf16>
    %cst = arith.constant dense<0.000000e+00> : vector<256x128xf32>
    %2 = tpu.matmul %0, %1, %cst {dimension_numbers = #tpu.dot_dimension_numbers<[1], [0], [0], [1], [0, 0, 1, 1], [], []>} : vector<256x36xbf16>, vector<36x128xbf16>, vector<256x128xf32> -> vector<256x128xf32>
    %3 = arith.truncf %2 : vector<256x128xf32> to vector<256x128xbf16>
    %c0_3 = arith.constant 0 : index
    %c0_4 = arith.constant 0 : index
    %4 = vector.load %arg4[%c0_3, %c0_4] : memref<256x128xbf16, #tpu.memory_space<vmem>>, vector<256x128xbf16>
    tpu.vector_store %arg4[%c0_3, %c0_4], %3 {strides = array<i32>} : memref<256x128xbf16, #tpu.memory_space<vmem>>, vector<256x128xbf16>,
    %c0_i32 = arith.constant 0 : i32
    %5 = arith.cmpi eq, %arg1, %c0_i32 : i32
    %6 = arith.extui %5 : i1 to i32
    %c0_i32_5 = arith.constant 0 : i32
    %7 = arith.cmpi ne, %6, %c0_i32_5 : i32
    scf.if %7 {
      %cst_16 = arith.constant 0.000000e+00 : f32
      %19 = vector.broadcast %cst_16 : f32 to vector<8x128xf32>
      %c0_17 = arith.constant 0 : index
      %c0_18 = arith.constant 0 : index
      %20 = vector.load %arg5[%c0_17, %c0_18] : memref<8x128xf32, #tpu.memory_space<vmem>>, vector<8x128xf32>
      tpu.vector_store %arg5[%c0_17, %c0_18], %19 {strides = array<i32>} : memref<8x128xf32, #tpu.memory_space<vmem>>, vector<8x128xf32>,
      %cst_19 = arith.constant 0.000000e+00 : f32
      %21 = vector.broadcast %cst_19 : f32 to vector<8x128xf32>
      %c0_20 = arith.constant 0 : index
      %c0_21 = arith.constant 0 : index
      %22 = vector.load %arg6[%c0_20, %c0_21] : memref<8x128xf32, #tpu.memory_space<vmem>>, vector<8x128xf32>
      tpu.vector_store %arg6[%c0_20, %c0_21], %21 {strides = array<i32>} : memref<8x128xf32, #tpu.memory_space<vmem>>, vector<8x128xf32>,
    } else {
    }
    %c0_6 = arith.constant 0 : index
    %c0_7 = arith.constant 0 : index
    %8 = vector.load %arg5[%c0_6, %c0_7] : memref<8x128xf32, #tpu.memory_space<vmem>>, vector<1x128xf32>
    %cst_8 = arith.constant dense<0.000000e+00> : vector<128xf32>
    %9 = vector.multi_reduction <add>, %2, %cst_8 [0] : vector<256x128xf32> to vector<128xf32>
    %10 = vector.shape_cast %9 : vector<128xf32> to vector<1x128xf32>
    %11 = arith.addf %8, %10 : vector<1x128xf32>
    %c0_9 = arith.constant 0 : index
    %c0_10 = arith.constant 0 : index
    %12 = vector.load %arg5[%c0_9, %c0_10] : memref<8x128xf32, #tpu.memory_space<vmem>>, vector<1x128xf32>
    tpu.vector_store %arg5[%c0_9, %c0_10], %11 {strides = array<i32>} : memref<8x128xf32, #tpu.memory_space<vmem>>, vector<1x128xf32>,
    %c0_11 = arith.constant 0 : index
    %c0_12 = arith.constant 0 : index
    %13 = vector.load %arg6[%c0_11, %c0_12] : memref<8x128xf32, #tpu.memory_space<vmem>>, vector<1x128xf32>
    %14 = arith.mulf %2, %2 : vector<256x128xf32>
    %cst_13 = arith.constant dense<0.000000e+00> : vector<128xf32>
    %15 = vector.multi_reduction <add>, %14, %cst_13 [0] : vector<256x128xf32> to vector<128xf32>
    %16 = vector.shape_cast %15 : vector<128xf32> to vector<1x128xf32>
    %17 = arith.addf %13, %16 : vector<1x128xf32>
    %c0_14 = arith.constant 0 : index
    %c0_15 = arith.constant 0 : index
    %18 = vector.load %arg6[%c0_14, %c0_15] : memref<8x128xf32, #tpu.memory_space<vmem>>, vector<1x128xf32>
    tpu.vector_store %arg6[%c0_14, %c0_15], %17 {strides = array<i32>} : memref<8x128xf32, #tpu.memory_space<vmem>>, vector<1x128xf32>,
    return
  }
  func.func @transform_0(%arg0: i32, %arg1: i32) -> (i32, i32) {
    %c1_i32 = arith.constant 1 : i32
    %0 = arith.muli %arg0, %c1_i32 : i32
    %1 = arith.addi %0, %arg1 : i32
    %c0_i32 = arith.constant 0 : i32
    %c0_i32_0 = arith.constant 0 : i32
    return %1, %c0_i32 : i32, i32
  }
  func.func @transform_1(%arg0: i32, %arg1: i32) -> (i32, i32) {
    %c0_i32 = arith.constant 0 : i32
    %c0_i32_0 = arith.constant 0 : i32
    %c0_i32_1 = arith.constant 0 : i32
    return %c0_i32, %c0_i32_0 : i32, i32
  }
  func.func @transform_2(%arg0: i32, %arg1: i32) -> (i32, i32) {
    %c1_i32 = arith.constant 1 : i32
    %0 = arith.muli %arg0, %c1_i32 : i32
    %1 = arith.addi %0, %arg1 : i32
    %c0_i32 = arith.constant 0 : i32
    %c0_i32_0 = arith.constant 0 : i32
    return %1, %c0_i32 : i32, i32
  }
  func.func @transform_3(%arg0: i32, %arg1: i32) -> (i32, i32) {
    %c0_i32 = arith.constant 0 : i32
    %c0_i32_0 = arith.constant 0 : i32
    return %arg0, %c0_i32 : i32, i32
  }
  func.func @transform_4(%arg0: i32, %arg1: i32) -> (i32, i32) {
    %c0_i32 = arith.constant 0 : i32
    %c0_i32_0 = arith.constant 0 : i32
    return %arg0, %c0_i32 : i32, i32
  }
}

module attributes {stable_mosaic.version = 11 : i64} {
  func.func @_bn_lrelu_kernel(%arg0: i32, %arg1: memref<512x128xbf16, #tpu.memory_space<vmem>>, %arg2: memref<1x128xf32, #tpu.memory_space<vmem>>, %arg3: memref<1x128xf32, #tpu.memory_space<vmem>>, %arg4: memref<512x128xbf16, #tpu.memory_space<vmem>>) attributes {dimension_semantics = [#tpu.dimension_semantics<parallel>], iteration_bounds = array<i64: 1>, scalar_prefetch = 0 : i64, scratch_operands = 0 : i64, tpu.core_type = #tpu.core_type<tc>, window_params = [{transform_indices = @transform_0, window_bounds = array<i64: 512, 128>}, {pipeline_mode = #tpu.pipeline_mode<synchronous>, transform_indices = @transform_1, window_bounds = array<i64: 1, 128>}, {pipeline_mode = #tpu.pipeline_mode<synchronous>, transform_indices = @transform_2, window_bounds = array<i64: 1, 128>}, {transform_indices = @transform_3, window_bounds = array<i64: 512, 128>}]} {
    %c0 = arith.constant 0 : index
    %c0_0 = arith.constant 0 : index
    %0 = vector.load %arg1[%c0, %c0_0] : memref<512x128xbf16, #tpu.memory_space<vmem>>, vector<512x128xbf16>
    %1 = arith.extf %0 : vector<512x128xbf16> to vector<512x128xf32>
    %c0_1 = arith.constant 0 : index
    %c0_2 = arith.constant 0 : index
    %2 = vector.load %arg2[%c0_1, %c0_2] : memref<1x128xf32, #tpu.memory_space<vmem>>, vector<1x128xf32>
    %3 = vector.broadcast %2 : vector<1x128xf32> to vector<512x128xf32>
    %4 = arith.mulf %1, %3 : vector<512x128xf32>
    %c0_3 = arith.constant 0 : index
    %c0_4 = arith.constant 0 : index
    %5 = vector.load %arg3[%c0_3, %c0_4] : memref<1x128xf32, #tpu.memory_space<vmem>>, vector<1x128xf32>
    %6 = vector.broadcast %5 : vector<1x128xf32> to vector<512x128xf32>
    %7 = arith.addf %4, %6 : vector<512x128xf32>
    %cst = arith.constant 0.000000e+00 : f32
    %8 = vector.broadcast %cst : f32 to vector<512x128xf32>
    %9 = arith.cmpf oge, %7, %8 : vector<512x128xf32>
    %cst_5 = arith.constant 1.000000e-01 : f32
    %10 = vector.broadcast %cst_5 : f32 to vector<512x128xf32>
    %11 = arith.mulf %10, %7 : vector<512x128xf32>
    %12 = arith.select %9, %7, %11 : vector<512x128xi1>, vector<512x128xf32>
    %13 = arith.truncf %12 : vector<512x128xf32> to vector<512x128xbf16>
    %c0_6 = arith.constant 0 : index
    %c0_7 = arith.constant 0 : index
    %14 = vector.load %arg4[%c0_6, %c0_7] : memref<512x128xbf16, #tpu.memory_space<vmem>>, vector<512x128xbf16>
    tpu.vector_store %arg4[%c0_6, %c0_7], %13 {strides = array<i32>} : memref<512x128xbf16, #tpu.memory_space<vmem>>, vector<512x128xbf16>,
    return
  }
  func.func @transform_0(%arg0: i32) -> (i32, i32) {
    %c0_i32 = arith.constant 0 : i32
    %c0_i32_0 = arith.constant 0 : i32
    return %arg0, %c0_i32 : i32, i32
  }
  func.func @transform_1(%arg0: i32) -> (i32, i32) {
    %c0_i32 = arith.constant 0 : i32
    %c0_i32_0 = arith.constant 0 : i32
    %c0_i32_1 = arith.constant 0 : i32
    return %c0_i32, %c0_i32_0 : i32, i32
  }
  func.func @transform_2(%arg0: i32) -> (i32, i32) {
    %c0_i32 = arith.constant 0 : i32
    %c0_i32_0 = arith.constant 0 : i32
    %c0_i32_1 = arith.constant 0 : i32
    return %c0_i32, %c0_i32_0 : i32, i32
  }
  func.func @transform_3(%arg0: i32) -> (i32, i32) {
    %c0_i32 = arith.constant 0 : i32
    %c0_i32_0 = arith.constant 0 : i32
    return %arg0, %c0_i32 : i32, i32
  }
}

</mosaic_0001>

<bundles_post_ra>
// kernel: cnn_block.2
= control target key start
LH: loop header
LB: loop body
LE: loop exit
PB: predicated region body
PF: predicated region fallthrough
CT: control target
= control target key end

     0   :  { %s1367_s15 = smov 0   ;;  %s1369_s16 = smov 0   ;;  %s1561_s0 = inlined_call_operand.vmem [shape: bf16[512,36], index: 0, kind: input, shape index: {}]   ;;  %s1562_s1 = inlined_call_operand.vmem [shape: bf16[36,128], index: 1, kind: input, shape index: {}]   ;;  %s1563_s2 = inlined_call_operand.vmem [shape: bf16[512,128], index: 2, kind: output, shape index: {0}]   ;;  %s1564_s3 = inlined_call_operand.vmem [shape: f32[16,128], index: 3, kind: output, shape index: {1}]   ;;  %s1565_s4 = inlined_call_operand.vmem [shape: f32[16,128], index: 4, kind: output, shape index: {2}]  }
   0x1   :  { %s1371_s17 = smov 0  }
   0x2 LB: > { %s27_s18 = sadd.s32 1, %s1335_s16  ;;  %p1005_p0 = scmp.ge.s32.totalorder %s1339_s17, 1  ;;  %s1339_s17 = sphi %s1371_s17, %s15_s17   ;;  %s1335_s16 = sphi %s1369_s16, %s1567_s16   ;;  %s1331_s15 = sphi %s1367_s15, %s1566_s15  }
   0x3   : > { %p29_p1 = scmp.ge.s32.totalorder %s27_s18, 2  ;;  %p186_p2 = scmp.lt.s32.totalorder %s1339_s17, 3 }
   0x5   : > { %s1569_s18 = smov (%p29_p1, %s27_s18), 0  ;;  %p187_p3 = pnand %p1005_p0, %p186_p2 }
   0x6   : > { %s1006_s23 = sshll.u32 (!%p187_p3), %s1331_s15, 5  ;;  %p238_p5 = scmp.lt.s32.totalorder (!%p187_p3), %s1331_s15, 1 }
   0x7   : > { %190 = sbr.rel (%p187_p3) target bundleno = 303 (0x12f), region = 28  ;;  %p224_p4 = scmp.lt.s32.totalorder (!%p187_p3), %s1006_s23, 63 }
   0xc   : > { %v1298_v0 = vld [vmem:[%s1562_s1 + $0x10] ss:$0 sps:$4 sm:$0x33]   ;;  %vm428_vm0 = vcmask 1041408   ;;  %v1299_v1 = vld [vmem:[%s1562_s1 + $0x8] sm:$0xff]   ;;  %v1300_v3 = vld [vmem:[%s1562_s1] sm:$0xff]  }
   0xd   : > { %1271 = vmatprep.subr.msk.bf16.mxu0 %vm428_vm0, %v1298_v0  ;;  %v430_v2 = vsel %vm428_vm0, %v1298_v0, 0  ;;  %1272 = vmatprep.subr.msk.bf16.mxu1 %vm428_vm0, %v1298_v0  ;;  %s1571_s23 = smov (!%p224_p4, %s1006_s23), 63  ;;  %vm379_vm1 = vcmask 293888   ;;  %s1573_s15 = smov (!%p238_p5, %s1331_s15), 1  ;;  %v1341_v20 = vmov 0.0  }
   0xe   : > { %1228 = vmatpush3.bf16.msra.mxu0 %v430_v2  ;;  %1268 = vmatpush3.bf16.msra.mxu1 %v430_v2  ;;  %s1007_s26 = sshll.u32 %s1571_s23, 2  ;;  %s1010_s30 = sshll.u32 %s1573_s15, 3 }
   0xf   : > { %1229 = vmatprep.subr.bf16.mxu0 %v1299_v1  ;;  %1266 = vmatprep.subr.bf16.mxu1 %v1299_v1  ;;  %s1405_s29 = scalar_lea.vmem %s1561_s0, %s1007_s26  ;;  %s1444_s7 = scalar_lea.vmem %s1564_s3, %s1010_s30 }
  0x10   : > { %v1301_v4 = vld [vmem:[%s1405_s29] sm:$0xff]   ;;  %v1302_v5 = vld [vmem:[%s1405_s29 + $0x8] sm:$0xff]   ;;  %v1303_v6 = vld [vmem:[%s1405_s29 + $0x10] sm:$0xff]   ;;  %s1449_s10 = scalar_lea.vmem %s1565_s4, %s1010_s30  ;;  %757 = vst [vmem:[%s1444_s7] sm:$0xff] %v1341_v20  ;;  %s1458_s13 = scalar_lea.vmem %s1563_s2, %s1007_s26 }
  0x11   : > { %1233 = vmatprep.mubr.msk.bf16.mxu0 %vm379_vm1, %v1301_v4  ;;  %v1304_v7 = vld [vmem:[%s1405_s29 + $0x18] sm:$0xff]   ;;  %v1305_v8 = vld [vmem:[%s1405_s29 + $0x20] sm:$0xff]   ;;  %v1310_v10 = vld [vmem:[%s1405_s29 + $0x48] sm:$0xff]   ;;  %758 = vst [vmem:[%s1449_s10] sm:$0xff] %v1341_v20 }
  0x12   : > { %1230 = vmatpush3.bf16.msra.mxu0 %v1299_v1  ;;  %1269 = vmatpush3.bf16.msra.mxu1 %v1299_v1  ;;  %v1309_v9 = vld [vmem:[%s1405_s29 + $0x40] sm:$0xff]   ;;  %v1311_v11 = vld [vmem:[%s1405_s29 + $0x50] sm:$0xff]   ;;  %v1312_v12 = vld [vmem:[%s1405_s29 + $0x58] sm:$0xff]  }
  0x13   : > { %1231 = vmatprep.subr.bf16.mxu0 %v1300_v3  ;;  %1267 = vmatprep.subr.bf16.mxu1 %v1300_v3  ;;  %v1313_v13 = vld [vmem:[%s1405_s29 + $0x60] sm:$0xff]   ;;  %v1306_v14 = vld [vmem:[%s1405_s29 + $0x28] sm:$0xff]   ;;  %v1307_v15 = vld [vmem:[%s1405_s29 + $0x30] sm:$0xff]  }
  0x14   : > { %1249 = vmatprep.mubr.msk.bf16.mxu1 %vm379_vm1, %v1309_v9  ;;  %v1314_v16 = vld [vmem:[%s1405_s29 + $0x68] sm:$0xff]   ;;  %v1315_v17 = vld [vmem:[%s1405_s29 + $0x70] sm:$0xff]   ;;  %v1308_v18 = vld [vmem:[%s1405_s29 + $0x38] sm:$0xff]  }
  0x15   : > { %v1316_v19 = vld [vmem:[%s1405_s29 + $0x78] sm:$0xff]  }
  0x16   : > { %1232 = vmatpush3.bf16.msra.mxu0 %v1300_v3  ;;  %1270 = vmatpush3.bf16.msra.mxu1 %v1300_v3 }
  0x19   : > { %1234 = vmatmul.mubr.msk.bf16.vlgmr.msra.gmra.mxu0 %vm379_vm1, %v1302_v5  ;;  %1250 = vmatmul.mubr.msk.bf16.vlgmr.msra.gmra.mxu1 %vm379_vm1, %v1310_v10 }
  0x1a   : > { %1237 = vmatprep.mubr.msk.bf16.mxu0 %vm379_vm1, %v1303_v6  ;;  %1253 = vmatprep.mubr.msk.bf16.mxu1 %vm379_vm1, %v1311_v11 }
  0x21   : > { %1238 = vmatmul.mubr.msk.bf16.gmra.mxu0 %vm379_vm1, %v1304_v7  ;;  %1254 = vmatmul.mubr.msk.bf16.gmra.mxu1 %vm379_vm1, %v1312_v12 }
  0x22   : > { %1241 = vmatprep.mubr.msk.bf16.mxu0 %vm379_vm1, %v1305_v8  ;;  %1257 = vmatprep.mubr.msk.bf16.mxu1 %vm379_vm1, %v1313_v13 }
  0x29   : > { %1242 = vmatmul.mubr.msk.bf16.gmra.mxu0 %vm379_vm1, %v1306_v14  ;;  %1258 = vmatmul.mubr.msk.bf16.gmra.mxu1 %vm379_vm1, %v1314_v16 }
  0x2a   : > { %1245 = vmatprep.mubr.msk.bf16.mxu0 %vm379_vm1, %v1307_v15  ;;  %1261 = vmatprep.mubr.msk.bf16.mxu1 %vm379_vm1, %v1315_v17 }
  0x31   : > { %1246 = vmatmul.mubr.msk.bf16.gmra.mxu0 %vm379_vm1, %v1308_v18  ;;  %1262 = vmatmul.mubr.msk.bf16.gmra.mxu1 %vm379_vm1, %v1316_v19 }
  0xd9   : > { %v1235_v21 = vpop.f32.mrf.mxu0  ;;  %v1460_v26 = vpop.f32.mrf.mxu1 }
  0xda   : > { %v802_v33 = vmul.f32 %v1235_v21, %v1235_v21 }
  0xdb   : > { %v466_v22 = vpop.f32.mrf.mxu0  ;;  %v1463_v32 = vpop.f32.mrf.mxu1 }
  0xdc   : > { %v800_v27 = vmul.f32 %v466_v22, %v466_v22 }
  0xdd   : > { %v1236_v23 = vpop.f32.mrf.mxu0  ;;  %v1466_v37 = vpop.f32.mrf.mxu1 }
  0xde   : > { %v1121_v24 = vpack.c.bf16 %v1236_v23, %v1235_v21  ;;  %v803_v38 = vmul.f32 %v1236_v23, %v1236_v23  ;;  %v1161_v41 = vpack.c.bf16 %v1466_v37, %v1460_v26 }
  0xdf   : > { %v469_v25 = vpop.f32.mrf.mxu0  ;;  %v1470_v43 = vpop.f32.mrf.mxu1 }
  0xe0   : > { %1193 = vst [vmem:[%s1458_s13 + $0x8] sm:$0xff] %v1121_v24   ;;  %v1116_v28 = vpack.c.bf16 %v469_v25, %v466_v22  ;;  %v760_v29 = vadd.f32 %v469_v25, %v466_v22  ;;  %v801_v30 = vmul.f32 %v469_v25, %v469_v25  ;;  %1201 = vst [vmem:[%s1458_s13 + $0x48] sm:$0xff] %v1161_v41  }
  0xe1   : > { %v1239_v31 = vpop.f32.mrf.mxu0  ;;  %v1156_v49 = vpack.c.bf16 %v1470_v43, %v1463_v32  ;;  %v1475_v50 = vpop.f32.mrf.mxu1 }
  0xe2   : > { %1117 = vst [vmem:[%s1458_s13] sm:$0xff] %v1116_v28   ;;  %v761_v34 = vadd.f32 %v1235_v21, %v760_v29  ;;  %v832_v35 = vadd.f32 %v801_v30, %v800_v27  ;;  %v806_v57 = vmul.f32 %v1239_v31, %v1239_v31 }
  0xe3   : > { %v482_v36 = vpop.f32.mrf.mxu0  ;;  %1200 = vst [vmem:[%s1458_s13 + $0x40] sm:$0xff] %v1156_v49   ;;  %v1479_v56 = vpop.f32.mrf.mxu1 }
  0xe4   : > { %v833_v39 = vadd.f32 %v832_v35, %v802_v33  ;;  %v762_v40 = vadd.f32 %v1236_v23, %v761_v34  ;;  %v804_v45 = vmul.f32 %v482_v36, %v482_v36 }
  0xe5   : > { %v1240_v42 = vpop.f32.mrf.mxu0  ;;  %v1482_v61 = vpop.f32.mrf.mxu1 }
  0xe6   : > { %v763_v44 = vadd.f32 %v762_v40, %v482_v36  ;;  %v834_v46 = vadd.f32 %v833_v39, %v803_v38  ;;  %v1131_v47 = vpack.c.bf16 %v1240_v42, %v1239_v31  ;;  %v807_v62 = vmul.f32 %v1240_v42, %v1240_v42 }
  0xe7   : > { %v485_v48 = vpop.f32.mrf.mxu0  ;;  %v1171_v1 = vpack.c.bf16 %v1482_v61, %v1475_v50  ;;  %v1486_v3 = vpop.f32.mrf.mxu1 }
  0xe8   : > { %v835_v51 = vadd.f32 %v834_v46, %v804_v45  ;;  %1195 = vst [vmem:[%s1458_s13 + $0x18] sm:$0xff] %v1131_v47   ;;  %v1126_v52 = vpack.c.bf16 %v485_v48, %v482_v36  ;;  %v764_v53 = vadd.f32 %v763_v44, %v485_v48  ;;  %v805_v54 = vmul.f32 %v485_v48, %v485_v48 }
  0xe9   : > { %v1243_v55 = vpop.f32.mrf.mxu0  ;;  %1203 = vst [vmem:[%s1458_s13 + $0x58] sm:$0xff] %v1171_v1   ;;  %v1166_v9 = vpack.c.bf16 %v1486_v3, %v1479_v56  ;;  %v1491_v10 = vpop.f32.mrf.mxu1 }
  0xea   : > { %1194 = vst [vmem:[%s1458_s13 + $0x10] sm:$0xff] %v1126_v52   ;;  %v765_v58 = vadd.f32 %v1239_v31, %v764_v53  ;;  %v836_v59 = vadd.f32 %v835_v51, %v805_v54  ;;  %v810_v17 = vmul.f32 %v1243_v55, %v1243_v55  ;;  %v816_v54 = vmul.f32 %v1463_v32, %v1463_v32 }
  0xeb   : > { %v498_v60 = vpop.f32.mrf.mxu0  ;;  %1202 = vst [vmem:[%s1458_s13 + $0x50] sm:$0xff] %v1166_v9   ;;  %v1495_v16 = vpop.f32.mrf.mxu1  ;;  %v821_v9 = vmul.f32 %v1486_v3, %v1486_v3 }
  0xec   : > { %v837_v63 = vadd.f32 %v836_v59, %v806_v57  ;;  %v766_v0 = vadd.f32 %v1240_v42, %v765_v58  ;;  %v808_v5 = vmul.f32 %v498_v60, %v498_v60 }
  0xed   : > { %v1244_v2 = vpop.f32.mrf.mxu0  ;;  %v1498_v21 = vpop.f32.mrf.mxu1 }
  0xee   : > { %v767_v4 = vadd.f32 %v766_v0, %v498_v60  ;;  %v838_v6 = vadd.f32 %v837_v63, %v807_v62  ;;  %v1141_v7 = vpack.c.bf16 %v1244_v2, %v1243_v55  ;;  %v811_v22 = vmul.f32 %v1244_v2, %v1244_v2 }
  0xef   : > { %v501_v8 = vpop.f32.mrf.mxu0  ;;  %v1181_v25 = vpack.c.bf16 %v1498_v21, %v1491_v10  ;;  %v565_v28 = vpop.f32.mrf.mxu1  ;;  %v818_v63 = vmul.f32 %v1460_v26, %v1460_v26 }
  0xf0   : > { %v839_v11 = vadd.f32 %v838_v6, %v808_v5  ;;  %1197 = vst [vmem:[%s1458_s13 + $0x28] sm:$0xff] %v1141_v7   ;;  %v1136_v12 = vpack.c.bf16 %v501_v8, %v498_v60  ;;  %v768_v13 = vadd.f32 %v767_v4, %v501_v8  ;;  %v809_v14 = vmul.f32 %v501_v8, %v501_v8 }
  0xf1   : > { %v1247_v15 = vpop.f32.mrf.mxu0  ;;  %1205 = vst [vmem:[%s1458_s13 + $0x68] sm:$0xff] %v1181_v25   ;;  %v1176_v35 = vpack.c.bf16 %v565_v28, %v1495_v16  ;;  %v1504_v36 = vpop.f32.mrf.mxu1  ;;  %v817_v60 = vmul.f32 %v1470_v43, %v1470_v43  ;;  %v820_v6 = vmul.f32 %v1479_v56, %v1479_v56 }
  0xf2   : > { %1196 = vst [vmem:[%s1458_s13 + $0x20] sm:$0xff] %v1136_v12   ;;  %v769_v18 = vadd.f32 %v1243_v55, %v768_v13  ;;  %v840_v19 = vadd.f32 %v839_v11, %v809_v14  ;;  %v814_v44 = vmul.f32 %v1247_v15, %v1247_v15 }
  0xf3   : > { %v514_v20 = vpop.f32.mrf.mxu0  ;;  %1204 = vst [vmem:[%s1458_s13 + $0x60] sm:$0xff] %v1176_v35   ;;  %v578_v42 = vpop.f32.mrf.mxu1 }
  0xf4   : > { %v841_v23 = vadd.f32 %v840_v19, %v810_v17  ;;  %v770_v24 = vadd.f32 %v1244_v2, %v769_v18  ;;  %v812_v30 = vmul.f32 %v514_v20, %v514_v20  ;;  %v819_v2 = vmul.f32 %v1466_v37, %v1466_v37 }
  0xf5   : > { %v1248_v27 = vpop.f32.mrf.mxu0  ;;  %v1264_v47 = vpop.f32.mrf.mxu1  ;;  %v825_v19 = vmul.f32 %v565_v28, %v565_v28 }
  0xf6   : > { %v771_v29 = vadd.f32 %v770_v24, %v514_v20  ;;  %v842_v31 = vadd.f32 %v841_v23, %v811_v22  ;;  %v1151_v33 = vpack.c.bf16 %v1248_v27, %v1247_v15  ;;  %v815_v48 = vmul.f32 %v1248_v27, %v1248_v27 }
  0xf7   : > { %v517_v34 = vpop.f32.mrf.mxu0  ;;  %v1191_v52 = vpack.c.bf16 %v1264_v47, %v1504_v36  ;;  %v581_v53 = vpop.f32.mrf.mxu1  ;;  %v827_v23 = vmul.f32 %v1498_v21, %v1498_v21 }
  0xf8   : > { %v843_v38 = vadd.f32 %v842_v31, %v812_v30  ;;  %1199 = vst [vmem:[%s1458_s13 + $0x38] sm:$0xff] %v1151_v33   ;;  %v1146_v39 = vpack.c.bf16 %v517_v34, %v514_v20  ;;  %v772_v40 = vadd.f32 %v771_v29, %v517_v34  ;;  %v813_v41 = vmul.f32 %v517_v34, %v517_v34 }
  0xf9   : > { %1207 = vst [vmem:[%s1458_s13 + $0x78] sm:$0xff] %v1191_v52   ;;  %v1186_v58 = vpack.c.bf16 %v581_v53, %v578_v42  ;;  %v826_v20 = vmul.f32 %v1491_v10, %v1491_v10  ;;  %v829_v31 = vmul.f32 %v581_v53, %v581_v53  ;;  %v831_v34 = vmul.f32 %v1264_v47, %v1264_v47 }
  0xfa   : > { %1198 = vst [vmem:[%s1458_s13 + $0x30] sm:$0xff] %v1146_v39   ;;  %v773_v45 = vadd.f32 %v1247_v15, %v772_v40  ;;  %v844_v46 = vadd.f32 %v843_v38, %v813_v41  ;;  %v824_v15 = vmul.f32 %v1495_v16, %v1495_v16 }
  0xfb   : > { %1206 = vst [vmem:[%s1458_s13 + $0x70] sm:$0xff] %v1186_v58  }
  0xfc   : > { %v774_v49 = vadd.f32 %v1248_v27, %v773_v45  ;;  %v845_v51 = vadd.f32 %v844_v46, %v814_v44  ;;  %v828_v27 = vmul.f32 %v578_v42, %v578_v42 }
  0xfe   : > { %v846_v55 = vadd.f32 %v845_v51, %v815_v48  ;;  %v775_v57 = vadd.f32 %v774_v49, %v1463_v32  ;;  %v759_v51 = vld [vmem:[%s1444_s7] sm:$0x1] }
 0x100   : > { %v776_v59 = vadd.f32 %v775_v57, %v1470_v43  ;;  %v847_v62 = vadd.f32 %v846_v55, %v816_v54 }
 0x102   : > { %v777_v0 = vadd.f32 %v1460_v26, %v776_v59  ;;  %v848_v1 = vadd.f32 %v847_v62, %v817_v60  ;;  %v822_v26 = vmul.f32 %v1475_v50, %v1475_v50 }
 0x104   : > { %v849_v4 = vadd.f32 %v848_v1, %v818_v63  ;;  %v778_v32 = vadd.f32 %v1466_v37, %v777_v0  ;;  %v823_v37 = vmul.f32 %v1482_v61, %v1482_v61 }
 0x106   : > { %v779_v5 = vadd.f32 %v778_v32, %v1479_v56  ;;  %v850_v43 = vadd.f32 %v849_v4, %v819_v2 }
 0x108   : > { %v851_v7 = vadd.f32 %v850_v43, %v820_v6  ;;  %v780_v8 = vadd.f32 %v779_v5, %v1486_v3 }
 0x10a   : > { %v781_v11 = vadd.f32 %v1475_v50, %v780_v8  ;;  %v852_v12 = vadd.f32 %v851_v7, %v821_v9 }
 0x10c   : > { %v853_v13 = vadd.f32 %v852_v12, %v822_v26  ;;  %v782_v14 = vadd.f32 %v1482_v61, %v781_v11 }
 0x10e   : > { %v783_v56 = vadd.f32 %v782_v14, %v1495_v16  ;;  %v854_v17 = vadd.f32 %v853_v13, %v823_v37 }
 0x110   : > { %v855_v18 = vadd.f32 %v854_v17, %v824_v15  ;;  %v784_v3 = vadd.f32 %v783_v56, %v565_v28  ;;  %v830_v28 = vmul.f32 %v1504_v36, %v1504_v36 }
 0x112   : > { %v785_v50 = vadd.f32 %v1491_v10, %v784_v3  ;;  %v856_v22 = vadd.f32 %v855_v18, %v825_v19 }
 0x114   : > { %v857_v24 = vadd.f32 %v856_v22, %v826_v20  ;;  %v786_v61 = vadd.f32 %v1498_v21, %v785_v50 }
 0x116   : > { %v787_v25 = vadd.f32 %v786_v61, %v578_v42  ;;  %v858_v29 = vadd.f32 %v857_v24, %v827_v23 }
 0x118   : > { %v859_v16 = vadd.f32 %v858_v29, %v828_v27  ;;  %v788_v30 = vadd.f32 %v787_v25, %v581_v53  ;;  %v799_v53 = vld [vmem:[%s1449_s10] sm:$0x1] }
 0x11a   : > { %v789_v33 = vadd.f32 %v1504_v36, %v788_v30  ;;  %v860_v10 = vadd.f32 %v859_v16, %v829_v31 }
 0x11c   : > { %v790_v35 = vadd.f32 %v1264_v47, %v789_v33  ;;  %v861_v38 = vadd.f32 %v860_v10, %v830_v28 }
 0x11e   : > { %v791_v39 = vrot.slane %v790_v35, 4  ;;  %v862_v21 = vadd.f32 %v861_v38, %v831_v34 }
 0x120   : > { %v792_v40 = vadd.f32 %v791_v39, %v790_v35  ;;  %v863_v41 = vrot.slane %v862_v21, 4 }
 0x122   : > { %v793_v42 = vrot.slane %v792_v40, 2  ;;  %v864_v44 = vadd.f32 %v863_v41, %v862_v21 }
 0x124   : > { %v794_v45 = vadd.f32 %v793_v42, %v792_v40  ;;  %v865_v46 = vrot.slane %v864_v44, 2 }
 0x126   : > { %v795_v48 = vrot.slane %v794_v45, 1  ;;  %v866_v49 = vadd.f32 %v865_v46, %v864_v44 }
 0x128   : > { %v796_v52 = vadd.f32 %v795_v48, %v794_v45  ;;  %v867_v36 = vrot.slane %v866_v49, 1 }
 0x12a   : > { %v797_v54 = vadd.f32 %v796_v52, %v759_v51  ;;  %v868_v55 = vadd.f32 %v867_v36, %v866_v49 }
 0x12c   : > { %798 = vst [vmem:[%s1444_s7] sm:$0x1] %v797_v54  ;;  %v869_v47 = vadd.f32 %v868_v55, %v799_v53 }
 0x12e   : > { %870 = vst [vmem:[%s1449_s10] sm:$0x1] %v869_v47 }
 0x12f PF: > { %s15_s17 = sadd.s32 1, %s1339_s17   ;;  %s1566_s15 = smov %s1335_s16 }
 0x130   : > { %p12_p6 = scmp.ge.s32.totalorder %s15_s17, 4   ;;  %s1567_s16 = smov %s1569_s18 }
 0x132   :  { %14 = sbr.rel (!%p12_p6) target bundleno = 2 (0x2), region = 86 }

// kernel: cnn_block.3
= control target key start
LH: loop header
LB: loop body
LE: loop exit
PB: predicated region body
PF: predicated region fallthrough
CT: control target
= control target key end

     0   :  { %s1631_s0 = inlined_call_operand.vmem [shape: bf16[512,128], index: 0, kind: input, shape index: {}, may-alias: {0,3}]   ;;  %s1632_s1 = inlined_call_operand.vmem [shape: f32[1,128], index: 1, kind: input, shape index: {}]   ;;  %s1633_s2 = inlined_call_operand.vmem [shape: f32[1,128], index: 2, kind: input, shape index: {}]   ;;  %s1634_s3 = inlined_call_operand.vmem [shape: bf16[512,128], index: 3, kind: output, shape index: {}, may-alias: {0,3}]  }
   0x1   :  { %v931_v0 = vld [vmem:[%s1631_s0] sm:$0xff]   ;;  %v1218_v4 = vld [vmem:[%s1631_s0 + $0x8] sm:$0xff]   ;;  %v1219_v5 = vld [vmem:[%s1631_s0 + $0x10] sm:$0xff]  }
   0x2   :  { %v1306_v1 = vld [vmem:[%s1632_s1] ss:$0 sm:$0xff]  ;;  %v932_v2 = vunpack.c.l.bf16 %v931_v0  ;;  %v933_v3 = vunpack.c.h.bf16 %v931_v0  ;;  %v1220_v6 = vld [vmem:[%s1631_s0 + $0x18] sm:$0xff]   ;;  %v936_v8 = vunpack.c.l.bf16 %v1218_v4  ;;  %v937_v9 = vunpack.c.h.bf16 %v1218_v4  ;;  %v1222_v35 = vld [vmem:[%s1631_s0 + $0x28] sm:$0xff]  }
   0x3   :  { %v1320_v7 = vld [vmem:[%s1633_s2] ss:$0 sm:$0xff]  ;;  %v940_v10 = vunpack.c.l.bf16 %v1219_v5  ;;  %v941_v11 = vunpack.c.h.bf16 %v1219_v5  ;;  %v944_v14 = vunpack.c.l.bf16 %v1220_v6  ;;  %v945_v15 = vunpack.c.h.bf16 %v1220_v6 }
   0x4   :  { %v149_v12 = vmul.f32 %v932_v2, %v1306_v1  ;;  %v150_v13 = vmul.f32 %v933_v3, %v1306_v1  ;;  %v151_v16 = vmul.f32 %v936_v8, %v1306_v1  ;;  %v152_v17 = vmul.f32 %v937_v9, %v1306_v1  ;;  %v1221_v34 = vld [vmem:[%s1631_s0 + $0x20] sm:$0xff]  }
   0x5   :  { %v153_v18 = vmul.f32 %v940_v10, %v1306_v1  ;;  %v154_v19 = vmul.f32 %v941_v11, %v1306_v1  ;;  %v155_v22 = vmul.f32 %v944_v14, %v1306_v1  ;;  %v156_v23 = vmul.f32 %v945_v15, %v1306_v1 }
   0x6   :  { %v220_v20 = vadd.f32 %v1320_v7, %v149_v12  ;;  %v221_v21 = vadd.f32 %v1320_v7, %v150_v13  ;;  %v222_v24 = vadd.f32 %v1320_v7, %v151_v16  ;;  %v223_v25 = vadd.f32 %v1320_v7, %v152_v17 }
   0x7   :  { %v224_v26 = vadd.f32 %v1320_v7, %v153_v18  ;;  %v225_v27 = vadd.f32 %v1320_v7, %v154_v19  ;;  %v226_v42 = vadd.f32 %v1320_v7, %v155_v22  ;;  %v227_v43 = vadd.f32 %v1320_v7, %v156_v23 }
   0x8   :  { %vm284_vm0 = vcmp.ge.f32.partialorder %v220_v20, 0.0  ;;  %vm285_vm1 = vcmp.ge.f32.partialorder %v221_v21, 0.0  ;;  %v348_v28 = vmul.f32 0.1, %v220_v20  ;;  %v349_v29 = vmul.f32 0.1, %v221_v21 }
   0x9   :  { %vm286_vm2 = vcmp.ge.f32.partialorder %v222_v24, 0.0  ;;  %vm287_vm3 = vcmp.ge.f32.partialorder %v223_v25, 0.0  ;;  %v350_v30 = vmul.f32 0.1, %v222_v24  ;;  %v351_v31 = vmul.f32 0.1, %v223_v25 }
   0xa   :  { %v412_v32 = vsel %vm284_vm0, %v220_v20, %v348_v28  ;;  %v413_v33 = vsel %vm285_vm1, %v221_v21, %v349_v29  ;;  %vm288_vm4 = vcmp.ge.f32.partialorder %v224_v26, 0.0  ;;  %vm289_vm5 = vcmp.ge.f32.partialorder %v225_v27, 0.0 }
   0xb   :  { %v1061_v36 = vpack.c.bf16 %v413_v33, %v412_v32  ;;  %v414_v37 = vsel %vm286_vm2, %v222_v24, %v350_v30  ;;  %v415_v38 = vsel %vm287_vm3, %v223_v25, %v351_v31  ;;  %v352_v39 = vmul.f32 0.1, %v224_v26 }
   0xc   :  { %v1066_v40 = vpack.c.bf16 %v415_v38, %v414_v37  ;;  %v353_v41 = vmul.f32 0.1, %v225_v27  ;;  %v948_v45 = vunpack.c.l.bf16 %v1221_v34  ;;  %v949_v46 = vunpack.c.h.bf16 %v1221_v34 }
   0xd   :  { %1062 = vst [vmem:[%s1634_s3] sm:$0xff] %v1061_v36   ;;  %v416_v44 = vsel %vm288_vm4, %v224_v26, %v352_v39  ;;  %v952_v47 = vunpack.c.l.bf16 %v1222_v35  ;;  %vm290_vm6 = vcmp.ge.f32.partialorder %v226_v42, 0.0  ;;  %vm291_vm7 = vcmp.ge.f32.partialorder %v227_v43, 0.0 }
   0xe   :  { %v417_v49 = vsel %vm289_vm5, %v225_v27, %v353_v41  ;;  %v354_v50 = vmul.f32 0.1, %v226_v42  ;;  %v355_v52 = vmul.f32 0.1, %v227_v43  ;;  %v157_v53 = vmul.f32 %v948_v45, %v1306_v1 }
   0xf   :  { %v1071_v51 = vpack.c.bf16 %v417_v49, %v416_v44  ;;  %v158_v54 = vmul.f32 %v949_v46, %v1306_v1  ;;  %v953_v56 = vunpack.c.h.bf16 %v1222_v35  ;;  %v159_v57 = vmul.f32 %v952_v47, %v1306_v1 }
  0x10   :  { %v418_v55 = vsel %vm290_vm6, %v226_v42, %v354_v50  ;;  %v419_v59 = vsel %vm291_vm7, %v227_v43, %v355_v52  ;;  %v228_v60 = vadd.f32 %v1320_v7, %v157_v53 }
  0x11   :  { %v229_v61 = vadd.f32 %v1320_v7, %v158_v54  ;;  %v1076_v63 = vpack.c.bf16 %v419_v59, %v418_v55  ;;  %v160_v0 = vmul.f32 %v953_v56, %v1306_v1  ;;  %v230_v2 = vadd.f32 %v1320_v7, %v159_v57 }
  0x12   :  { %vm292_vm8 = vcmp.ge.f32.partialorder %v228_v60, 0.0  ;;  %v356_v5 = vmul.f32 0.1, %v228_v60 }
  0x13   :  { %vm293_vm9 = vcmp.ge.f32.partialorder %v229_v61, 0.0  ;;  %v357_v6 = vmul.f32 0.1, %v229_v61  ;;  %v231_v8 = vadd.f32 %v1320_v7, %v160_v0  ;;  %vm294_vm10 = vcmp.ge.f32.partialorder %v230_v2, 0.0 }
  0x14   :  { %v1223_v48 = vld [vmem:[%s1631_s0 + $0x30] sm:$0xff]   ;;  %v358_v9 = vmul.f32 0.1, %v230_v2  ;;  %v420_v11 = vsel %vm292_vm8, %v228_v60, %v356_v5 }
  0x15   :  { %1249 = vst [vmem:[%s1634_s3 + $0x8] sm:$0xff] %v1066_v40   ;;  %v956_v58 = vunpack.c.l.bf16 %v1223_v48  ;;  %1250 = vst [vmem:[%s1634_s3 + $0x10] sm:$0xff] %v1071_v51   ;;  %v957_v62 = vunpack.c.h.bf16 %v1223_v48  ;;  %v421_v12 = vsel %vm293_vm9, %v229_v61, %v357_v6  ;;  %vm295_vm11 = vcmp.ge.f32.partialorder %v231_v8, 0.0 }
  0x16   :  { %v1081_v16 = vpack.c.bf16 %v421_v12, %v420_v11  ;;  %v359_v17 = vmul.f32 0.1, %v231_v8  ;;  %v422_v18 = vsel %vm294_vm10, %v230_v2, %v358_v9 }
  0x17   :  { %v161_v3 = vmul.f32 %v956_v58, %v1306_v1  ;;  %v162_v10 = vmul.f32 %v957_v62, %v1306_v1 }
  0x18   :  { %v423_v22 = vsel %vm295_vm11, %v231_v8, %v359_v17 }
  0x19   :  { %v232_v13 = vadd.f32 %v1320_v7, %v161_v3  ;;  %v233_v19 = vadd.f32 %v1320_v7, %v162_v10  ;;  %v1086_v28 = vpack.c.bf16 %v423_v22, %v422_v18 }
  0x1b   :  { %vm296_vm12 = vcmp.ge.f32.partialorder %v232_v13, 0.0  ;;  %v360_v20 = vmul.f32 0.1, %v232_v13  ;;  %vm297_vm13 = vcmp.ge.f32.partialorder %v233_v19, 0.0  ;;  %v361_v29 = vmul.f32 0.1, %v233_v19 }
  0x1c   :  { %v1224_v4 = vld [vmem:[%s1631_s0 + $0x38] sm:$0xff]  }
  0x1d   :  { %1251 = vst [vmem:[%s1634_s3 + $0x18] sm:$0xff] %v1076_v63   ;;  %v960_v14 = vunpack.c.l.bf16 %v1224_v4  ;;  %v961_v21 = vunpack.c.h.bf16 %v1224_v4  ;;  %v424_v30 = vsel %vm296_vm12, %v232_v13, %v360_v20  ;;  %v425_v35 = vsel %vm297_vm13, %v233_v19, %v361_v29 }
  0x1e   :  { %v1091_v39 = vpack.c.bf16 %v425_v35, %v424_v30 }
  0x1f   :  { %v163_v23 = vmul.f32 %v960_v14, %v1306_v1  ;;  %v164_v31 = vmul.f32 %v961_v21, %v1306_v1 }
  0x21   :  { %v234_v32 = vadd.f32 %v1320_v7, %v163_v23  ;;  %v235_v40 = vadd.f32 %v1320_v7, %v164_v31 }
  0x23   :  { %vm298_vm14 = vcmp.ge.f32.partialorder %v234_v32, 0.0  ;;  %v362_v41 = vmul.f32 0.1, %v234_v32  ;;  %vm299_vm15 = vcmp.ge.f32.partialorder %v235_v40, 0.0  ;;  %v363_v46 = vmul.f32 0.1, %v235_v40 }
  0x24   :  { %v1225_v15 = vld [vmem:[%s1631_s0 + $0x40] sm:$0xff]  }
  0x25   :  { %1252 = vst [vmem:[%s1634_s3 + $0x20] sm:$0xff] %v1081_v16   ;;  %v964_v24 = vunpack.c.l.bf16 %v1225_v15  ;;  %v965_v25 = vunpack.c.h.bf16 %v1225_v15  ;;  %v426_v47 = vsel %vm298_vm14, %v234_v32, %v362_v41  ;;  %v427_v51 = vsel %vm299_vm15, %v235_v40, %v363_v46 }
  0x26   :  { %v1096_v56 = vpack.c.bf16 %v427_v51, %v426_v47 }
  0x27   :  { %v165_v33 = vmul.f32 %v964_v24, %v1306_v1  ;;  %v166_v34 = vmul.f32 %v965_v25, %v1306_v1 }
  0x29   :  { %v236_v42 = vadd.f32 %v1320_v7, %v165_v33  ;;  %v237_v43 = vadd.f32 %v1320_v7, %v166_v34 }
  0x2b   :  { %vm300_vm0 = vcmp.ge.f32.partialorder %v236_v42, 0.0  ;;  %vm301_vm1 = vcmp.ge.f32.partialorder %v237_v43, 0.0  ;;  %v364_v49 = vmul.f32 0.1, %v236_v42  ;;  %v365_v50 = vmul.f32 0.1, %v237_v43 }
  0x2c   :  { %v1226_v26 = vld [vmem:[%s1631_s0 + $0x48] sm:$0xff]   ;;  %v1227_v27 = vld [vmem:[%s1631_s0 + $0x50] sm:$0xff]  }
  0x2d   :  { %1253 = vst [vmem:[%s1634_s3 + $0x28] sm:$0xff] %v1086_v28   ;;  %v968_v36 = vunpack.c.l.bf16 %v1226_v26  ;;  %v969_v37 = vunpack.c.h.bf16 %v1226_v26  ;;  %v972_v38 = vunpack.c.l.bf16 %v1227_v27  ;;  %1254 = vst [vmem:[%s1634_s3 + $0x30] sm:$0xff] %v1091_v39   ;;  %v973_v48 = vunpack.c.h.bf16 %v1227_v27 }
  0x2e   :  { %v428_v57 = vsel %vm300_vm0, %v236_v42, %v364_v49  ;;  %v429_v58 = vsel %vm301_vm1, %v237_v43, %v365_v50 }
  0x2f   :  { %v167_v44 = vmul.f32 %v968_v36, %v1306_v1  ;;  %v168_v45 = vmul.f32 %v969_v37, %v1306_v1  ;;  %v169_v54 = vmul.f32 %v972_v38, %v1306_v1  ;;  %v170_v59 = vmul.f32 %v973_v48, %v1306_v1 }
  0x30   :  { %v1101_v61 = vpack.c.bf16 %v429_v58, %v428_v57 }
  0x31   :  { %v238_v52 = vadd.f32 %v1320_v7, %v167_v44  ;;  %v239_v53 = vadd.f32 %v1320_v7, %v168_v45  ;;  %v240_v0 = vadd.f32 %v1320_v7, %v169_v54  ;;  %v241_v2 = vadd.f32 %v1320_v7, %v170_v59 }
  0x33   :  { %vm302_vm2 = vcmp.ge.f32.partialorder %v238_v52, 0.0  ;;  %vm303_vm3 = vcmp.ge.f32.partialorder %v239_v53, 0.0  ;;  %v366_v62 = vmul.f32 0.1, %v238_v52  ;;  %v367_v63 = vmul.f32 0.1, %v239_v53 }
  0x34   :  { %v1228_v55 = vld [vmem:[%s1631_s0 + $0x58] sm:$0xff]   ;;  %v1229_v60 = vld [vmem:[%s1631_s0 + $0x60] sm:$0xff]   ;;  %vm304_vm4 = vcmp.ge.f32.partialorder %v240_v0, 0.0  ;;  %vm305_vm5 = vcmp.ge.f32.partialorder %v241_v2, 0.0  ;;  %v368_v11 = vmul.f32 0.1, %v240_v0 }
  0x35   :  { %1255 = vst [vmem:[%s1634_s3 + $0x38] sm:$0xff] %v1096_v56   ;;  %v976_v3 = vunpack.c.l.bf16 %v1228_v55  ;;  %1256 = vst [vmem:[%s1634_s3 + $0x40] sm:$0xff] %v1101_v61   ;;  %v430_v4 = vsel %vm302_vm2, %v238_v52, %v366_v62  ;;  %v977_v5 = vunpack.c.h.bf16 %v1228_v55  ;;  %v980_v6 = vunpack.c.l.bf16 %v1229_v60 }
  0x36   :  { %v981_v8 = vunpack.c.h.bf16 %v1229_v60  ;;  %v431_v10 = vsel %vm303_vm3, %v239_v53, %v367_v63  ;;  %v369_v13 = vmul.f32 0.1, %v241_v2  ;;  %v432_v16 = vsel %vm304_vm4, %v240_v0, %v368_v11 }
  0x37   :  { %v1106_v12 = vpack.c.bf16 %v431_v10, %v430_v4  ;;  %v171_v14 = vmul.f32 %v976_v3, %v1306_v1  ;;  %v172_v15 = vmul.f32 %v977_v5, %v1306_v1  ;;  %v173_v17 = vmul.f32 %v980_v6, %v1306_v1 }
  0x38   :  { %v174_v18 = vmul.f32 %v981_v8, %v1306_v1  ;;  %v433_v20 = vsel %vm305_vm5, %v241_v2, %v369_v13 }
  0x39   :  { %v242_v21 = vadd.f32 %v1320_v7, %v171_v14  ;;  %v243_v22 = vadd.f32 %v1320_v7, %v172_v15  ;;  %v1111_v24 = vpack.c.bf16 %v433_v20, %v432_v16  ;;  %v244_v25 = vadd.f32 %v1320_v7, %v173_v17 }
  0x3a   :  { %v245_v26 = vadd.f32 %v1320_v7, %v174_v18 }
  0x3b   :  { %vm306_vm6 = vcmp.ge.f32.partialorder %v242_v21, 0.0  ;;  %vm307_vm7 = vcmp.ge.f32.partialorder %v243_v22, 0.0  ;;  %v370_v29 = vmul.f32 0.1, %v242_v21  ;;  %v371_v30 = vmul.f32 0.1, %v243_v22 }
  0x3c   :  { %v1230_v9 = vld [vmem:[%s1631_s0 + $0x68] sm:$0xff]   ;;  %vm308_vm8 = vcmp.ge.f32.partialorder %v244_v25, 0.0  ;;  %vm309_vm9 = vcmp.ge.f32.partialorder %v245_v26, 0.0  ;;  %v372_v31 = vmul.f32 0.1, %v244_v25 }
  0x3d   :  { %v984_v19 = vunpack.c.l.bf16 %v1230_v9  ;;  %1257 = vst [vmem:[%s1634_s3 + $0x48] sm:$0xff] %v1106_v12   ;;  %v985_v23 = vunpack.c.h.bf16 %v1230_v9  ;;  %v373_v32 = vmul.f32 0.1, %v245_v26  ;;  %v434_v33 = vsel %vm306_vm6, %v242_v21, %v370_v29 }
  0x3e   :  { %v435_v34 = vsel %vm307_vm7, %v243_v22, %v371_v30  ;;  %v436_v39 = vsel %vm308_vm8, %v244_v25, %v372_v31 }
  0x3f   :  { %v175_v27 = vmul.f32 %v984_v19, %v1306_v1  ;;  %v176_v35 = vmul.f32 %v985_v23, %v1306_v1  ;;  %v1116_v38 = vpack.c.bf16 %v435_v34, %v434_v33  ;;  %v437_v40 = vsel %vm309_vm9, %v245_v26, %v373_v32 }
  0x40   :  { %v1121_v43 = vpack.c.bf16 %v437_v40, %v436_v39 }
  0x41   :  { %v246_v36 = vadd.f32 %v1320_v7, %v175_v27  ;;  %v247_v44 = vadd.f32 %v1320_v7, %v176_v35 }
  0x43   :  { %vm310_vm10 = vcmp.ge.f32.partialorder %v246_v36, 0.0  ;;  %v374_v45 = vmul.f32 0.1, %v246_v36  ;;  %vm311_vm11 = vcmp.ge.f32.partialorder %v247_v44, 0.0  ;;  %v375_v51 = vmul.f32 0.1, %v247_v44 }
  0x44   :  { %v1231_v28 = vld [vmem:[%s1631_s0 + $0x70] sm:$0xff]  }
  0x45   :  { %1258 = vst [vmem:[%s1634_s3 + $0x50] sm:$0xff] %v1111_v24   ;;  %v988_v41 = vunpack.c.l.bf16 %v1231_v28  ;;  %v989_v46 = vunpack.c.h.bf16 %v1231_v28  ;;  %v438_v52 = vsel %vm310_vm10, %v246_v36, %v374_v45  ;;  %v439_v58 = vsel %vm311_vm11, %v247_v44, %v375_v51 }
  0x46   :  { %v1126_v62 = vpack.c.bf16 %v439_v58, %v438_v52 }
  0x47   :  { %v177_v47 = vmul.f32 %v988_v41, %v1306_v1  ;;  %v178_v54 = vmul.f32 %v989_v46, %v1306_v1 }
  0x49   :  { %v248_v55 = vadd.f32 %v1320_v7, %v177_v47  ;;  %v249_v63 = vadd.f32 %v1320_v7, %v178_v54 }
  0x4b   :  { %vm312_vm12 = vcmp.ge.f32.partialorder %v248_v55, 0.0  ;;  %v376_v0 = vmul.f32 0.1, %v248_v55  ;;  %vm313_vm13 = vcmp.ge.f32.partialorder %v249_v63, 0.0  ;;  %v377_v6 = vmul.f32 0.1, %v249_v63 }
  0x4c   :  { %v1232_v37 = vld [vmem:[%s1631_s0 + $0x78] sm:$0xff]   ;;  %v1233_v42 = vld [vmem:[%s1631_s0 + $0x80] sm:$0xff]  }
  0x4d   :  { %1259 = vst [vmem:[%s1634_s3 + $0x58] sm:$0xff] %v1116_v38   ;;  %v992_v48 = vunpack.c.l.bf16 %v1232_v37  ;;  %v993_v49 = vunpack.c.h.bf16 %v1232_v37  ;;  %v996_v53 = vunpack.c.l.bf16 %v1233_v42  ;;  %v997_v59 = vunpack.c.h.bf16 %v1233_v42 }
  0x4e   :  { %v440_v8 = vsel %vm312_vm12, %v248_v55, %v376_v0  ;;  %v441_v12 = vsel %vm313_vm13, %v249_v63, %v377_v6 }
  0x4f   :  { %v179_v56 = vmul.f32 %v992_v48, %v1306_v1  ;;  %v180_v57 = vmul.f32 %v993_v49, %v1306_v1  ;;  %v181_v60 = vmul.f32 %v996_v53, %v1306_v1  ;;  %v182_v4 = vmul.f32 %v997_v59, %v1306_v1 }
  0x50   :  { %v1131_v16 = vpack.c.bf16 %v441_v12, %v440_v8 }
  0x51   :  { %v250_v2 = vadd.f32 %v1320_v7, %v179_v56  ;;  %v251_v3 = vadd.f32 %v1320_v7, %v180_v57  ;;  %v252_v5 = vadd.f32 %v1320_v7, %v181_v60  ;;  %v253_v13 = vadd.f32 %v1320_v7, %v182_v4 }
  0x53   :  { %vm314_vm14 = vcmp.ge.f32.partialorder %v250_v2, 0.0  ;;  %vm315_vm15 = vcmp.ge.f32.partialorder %v251_v3, 0.0  ;;  %v378_v10 = vmul.f32 0.1, %v250_v2  ;;  %v379_v11 = vmul.f32 0.1, %v251_v3 }
  0x54   :  { %v1234_v50 = vld [vmem:[%s1631_s0 + $0x88] sm:$0xff]   ;;  %vm316_vm0 = vcmp.ge.f32.partialorder %v252_v5, 0.0  ;;  %v380_v14 = vmul.f32 0.1, %v252_v5  ;;  %vm317_vm1 = vcmp.ge.f32.partialorder %v253_v13, 0.0 }
  0x55   :  { %1260 = vst [vmem:[%s1634_s3 + $0x60] sm:$0xff] %v1121_v43   ;;  %v1000_v61 = vunpack.c.l.bf16 %v1234_v50  ;;  %1261 = vst [vmem:[%s1634_s3 + $0x68] sm:$0xff] %v1126_v62   ;;  %v1001_v9 = vunpack.c.h.bf16 %v1234_v50  ;;  %v442_v17 = vsel %vm314_vm14, %v250_v2, %v378_v10  ;;  %v443_v18 = vsel %vm315_vm15, %v251_v3, %v379_v11 }
  0x56   :  { %v1136_v22 = vpack.c.bf16 %v443_v18, %v442_v17  ;;  %v381_v23 = vmul.f32 0.1, %v253_v13  ;;  %v444_v24 = vsel %vm316_vm0, %v252_v5, %v380_v14 }
  0x57   :  { %v183_v19 = vmul.f32 %v1000_v61, %v1306_v1  ;;  %v184_v25 = vmul.f32 %v1001_v9, %v1306_v1 }
  0x58   :  { %v445_v29 = vsel %vm317_vm1, %v253_v13, %v381_v23 }
  0x59   :  { %v254_v26 = vadd.f32 %v1320_v7, %v183_v19  ;;  %v1141_v33 = vpack.c.bf16 %v445_v29, %v444_v24  ;;  %v255_v34 = vadd.f32 %v1320_v7, %v184_v25 }
  0x5b   :  { %vm318_vm2 = vcmp.ge.f32.partialorder %v254_v26, 0.0  ;;  %v382_v35 = vmul.f32 0.1, %v254_v26  ;;  %vm319_vm3 = vcmp.ge.f32.partialorder %v255_v34, 0.0  ;;  %v383_v41 = vmul.f32 0.1, %v255_v34 }
  0x5c   :  { %v1235_v15 = vld [vmem:[%s1631_s0 + $0x90] sm:$0xff]   ;;  %v1236_v20 = vld [vmem:[%s1631_s0 + $0x98] sm:$0xff]   ;;  %v1237_v21 = vld [vmem:[%s1631_s0 + $0xa0] sm:$0xff]  }
  0x5d   :  { %1262 = vst [vmem:[%s1634_s3 + $0x70] sm:$0xff] %v1131_v16   ;;  %v1004_v27 = vunpack.c.l.bf16 %v1235_v15  ;;  %v1005_v28 = vunpack.c.h.bf16 %v1235_v15  ;;  %1263 = vst [vmem:[%s1634_s3 + $0x78] sm:$0xff] %v1136_v22   ;;  %v1008_v30 = vunpack.c.l.bf16 %v1236_v20  ;;  %v1009_v31 = vunpack.c.h.bf16 %v1236_v20 }
  0x5e   :  { %v1012_v32 = vunpack.c.l.bf16 %v1237_v21  ;;  %v446_v42 = vsel %vm318_vm2, %v254_v26, %v382_v35  ;;  %v1013_v43 = vunpack.c.h.bf16 %v1237_v21  ;;  %v447_v48 = vsel %vm319_vm3, %v255_v34, %v383_v41 }
  0x5f   :  { %v185_v36 = vmul.f32 %v1004_v27, %v1306_v1  ;;  %v186_v37 = vmul.f32 %v1005_v28, %v1306_v1  ;;  %v187_v38 = vmul.f32 %v1008_v30, %v1306_v1  ;;  %v188_v39 = vmul.f32 %v1009_v31, %v1306_v1 }
  0x60   :  { %v189_v49 = vmul.f32 %v1012_v32, %v1306_v1  ;;  %v190_v50 = vmul.f32 %v1013_v43, %v1306_v1  ;;  %v1146_v52 = vpack.c.bf16 %v447_v48, %v446_v42 }
  0x61   :  { %v256_v44 = vadd.f32 %v1320_v7, %v185_v36  ;;  %v257_v45 = vadd.f32 %v1320_v7, %v186_v37  ;;  %v258_v46 = vadd.f32 %v1320_v7, %v187_v38  ;;  %v259_v47 = vadd.f32 %v1320_v7, %v188_v39 }
  0x62   :  { %v260_v58 = vadd.f32 %v1320_v7, %v189_v49  ;;  %v261_v59 = vadd.f32 %v1320_v7, %v190_v50 }
  0x63   :  { %vm320_vm4 = vcmp.ge.f32.partialorder %v256_v44, 0.0  ;;  %vm321_vm5 = vcmp.ge.f32.partialorder %v257_v45, 0.0  ;;  %v384_v53 = vmul.f32 0.1, %v256_v44  ;;  %v385_v54 = vmul.f32 0.1, %v257_v45 }
  0x64   :  { %v1238_v40 = vld [vmem:[%s1631_s0 + $0xa8] sm:$0xff]   ;;  %vm322_vm6 = vcmp.ge.f32.partialorder %v258_v46, 0.0  ;;  %vm323_vm7 = vcmp.ge.f32.partialorder %v259_v47, 0.0  ;;  %v386_v55 = vmul.f32 0.1, %v258_v46  ;;  %vm324_vm8 = vcmp.ge.f32.partialorder %v260_v58, 0.0 }
  0x65   :  { %1264 = vst [vmem:[%s1634_s3 + $0x80] sm:$0xff] %v1141_v33   ;;  %v1016_v51 = vunpack.c.l.bf16 %v1238_v40  ;;  %1265 = vst [vmem:[%s1634_s3 + $0x88] sm:$0xff] %v1146_v52   ;;  %v448_v56 = vsel %vm320_vm4, %v256_v44, %v384_v53  ;;  %v387_v57 = vmul.f32 0.1, %v259_v47  ;;  %v449_v60 = vsel %vm321_vm5, %v257_v45, %v385_v54 }
  0x66   :  { %v450_v61 = vsel %vm322_vm6, %v258_v46, %v386_v55  ;;  %v1017_v62 = vunpack.c.h.bf16 %v1238_v40  ;;  %v1151_v3 = vpack.c.bf16 %v449_v60, %v448_v56  ;;  %vm325_vm9 = vcmp.ge.f32.partialorder %v261_v59, 0.0 }
  0x67   :  { %v191_v63 = vmul.f32 %v1016_v51, %v1306_v1  ;;  %v451_v4 = vsel %vm323_vm7, %v259_v47, %v387_v57  ;;  %v388_v6 = vmul.f32 0.1, %v260_v58  ;;  %v389_v8 = vmul.f32 0.1, %v261_v59 }
  0x68   :  { %v1156_v5 = vpack.c.bf16 %v451_v4, %v450_v61  ;;  %v192_v9 = vmul.f32 %v1017_v62, %v1306_v1 }
  0x69   :  { %v262_v10 = vadd.f32 %v1320_v7, %v191_v63  ;;  %v452_v14 = vsel %vm324_vm8, %v260_v58, %v388_v6  ;;  %v453_v15 = vsel %vm325_vm9, %v261_v59, %v389_v8 }
  0x6a   :  { %v263_v16 = vadd.f32 %v1320_v7, %v192_v9  ;;  %v1161_v19 = vpack.c.bf16 %v453_v15, %v452_v14 }
  0x6b   :  { %vm326_vm10 = vcmp.ge.f32.partialorder %v262_v10, 0.0  ;;  %v390_v20 = vmul.f32 0.1, %v262_v10 }
  0x6c   :  { %v1239_v0 = vld [vmem:[%s1631_s0 + $0xb0] sm:$0xff]   ;;  %v1240_v2 = vld [vmem:[%s1631_s0 + $0xb8] sm:$0xff]   ;;  %vm327_vm11 = vcmp.ge.f32.partialorder %v263_v16, 0.0  ;;  %v391_v22 = vmul.f32 0.1, %v263_v16 }
  0x6d   :  { %1266 = vst [vmem:[%s1634_s3 + $0x90] sm:$0xff] %v1151_v3   ;;  %v1020_v11 = vunpack.c.l.bf16 %v1239_v0  ;;  %v1021_v12 = vunpack.c.h.bf16 %v1239_v0  ;;  %v1024_v13 = vunpack.c.l.bf16 %v1240_v2  ;;  %1267 = vst [vmem:[%s1634_s3 + $0x98] sm:$0xff] %v1156_v5   ;;  %v1025_v17 = vunpack.c.h.bf16 %v1240_v2 }
  0x6e   :  { %v454_v25 = vsel %vm326_vm10, %v262_v10, %v390_v20  ;;  %v455_v29 = vsel %vm327_vm11, %v263_v16, %v391_v22 }
  0x6f   :  { %v193_v21 = vmul.f32 %v1020_v11, %v1306_v1  ;;  %v194_v23 = vmul.f32 %v1021_v12, %v1306_v1  ;;  %v195_v24 = vmul.f32 %v1024_v13, %v1306_v1  ;;  %v196_v27 = vmul.f32 %v1025_v17, %v1306_v1 }
  0x70   :  { %v1166_v33 = vpack.c.bf16 %v455_v29, %v454_v25 }
  0x71   :  { %v264_v26 = vadd.f32 %v1320_v7, %v193_v21  ;;  %v265_v30 = vadd.f32 %v1320_v7, %v194_v23  ;;  %v266_v31 = vadd.f32 %v1320_v7, %v195_v24  ;;  %v267_v35 = vadd.f32 %v1320_v7, %v196_v27 }
  0x73   :  { %vm328_vm12 = vcmp.ge.f32.partialorder %v264_v26, 0.0  ;;  %v392_v34 = vmul.f32 0.1, %v264_v26  ;;  %vm329_vm13 = vcmp.ge.f32.partialorder %v265_v30, 0.0  ;;  %v393_v37 = vmul.f32 0.1, %v265_v30 }
  0x74   :  { %v1241_v18 = vld [vmem:[%s1631_s0 + $0xc0] sm:$0xff]   ;;  %vm330_vm14 = vcmp.ge.f32.partialorder %v266_v31, 0.0  ;;  %v394_v38 = vmul.f32 0.1, %v266_v31  ;;  %vm331_vm15 = vcmp.ge.f32.partialorder %v267_v35, 0.0 }
  0x75   :  { %1268 = vst [vmem:[%s1634_s3 + $0xa0] sm:$0xff] %v1161_v19   ;;  %v1028_v28 = vunpack.c.l.bf16 %v1241_v18  ;;  %v1029_v32 = vunpack.c.h.bf16 %v1241_v18  ;;  %v456_v39 = vsel %vm328_vm12, %v264_v26, %v392_v34  ;;  %v395_v40 = vmul.f32 0.1, %v267_v35 }
  0x76   :  { %v457_v43 = vsel %vm329_vm13, %v265_v30, %v393_v37  ;;  %v458_v44 = vsel %vm330_vm14, %v266_v31, %v394_v38 }
  0x77   :  { %v197_v41 = vmul.f32 %v1028_v28, %v1306_v1  ;;  %v198_v45 = vmul.f32 %v1029_v32, %v1306_v1  ;;  %v1171_v47 = vpack.c.bf16 %v457_v43, %v456_v39  ;;  %v459_v48 = vsel %vm331_vm15, %v267_v35, %v395_v40 }
  0x78   :  { %v1176_v51 = vpack.c.bf16 %v459_v48, %v458_v44 }
  0x79   :  { %v268_v49 = vadd.f32 %v1320_v7, %v197_v41  ;;  %v269_v52 = vadd.f32 %v1320_v7, %v198_v45 }
  0x7b   :  { %vm332_vm0 = vcmp.ge.f32.partialorder %v268_v49, 0.0  ;;  %v396_v56 = vmul.f32 0.1, %v268_v49  ;;  %vm333_vm1 = vcmp.ge.f32.partialorder %v269_v52, 0.0  ;;  %v397_v59 = vmul.f32 0.1, %v269_v52 }
  0x7c   :  { %v1242_v36 = vld [vmem:[%s1631_s0 + $0xc8] sm:$0xff]  }
  0x7d   :  { %1269 = vst [vmem:[%s1634_s3 + $0xa8] sm:$0xff] %v1166_v33   ;;  %v1032_v46 = vunpack.c.l.bf16 %v1242_v36  ;;  %v1033_v50 = vunpack.c.h.bf16 %v1242_v36  ;;  %v460_v62 = vsel %vm332_vm0, %v268_v49, %v396_v56  ;;  %v461_v3 = vsel %vm333_vm1, %v269_v52, %v397_v59 }
  0x7e   :  { %v1181_v6 = vpack.c.bf16 %v461_v3, %v460_v62 }
  0x7f   :  { %v199_v53 = vmul.f32 %v1032_v46, %v1306_v1  ;;  %v200_v57 = vmul.f32 %v1033_v50, %v1306_v1 }
  0x81   :  { %v270_v60 = vadd.f32 %v1320_v7, %v199_v53  ;;  %v271_v63 = vadd.f32 %v1320_v7, %v200_v57 }
  0x83   :  { %vm334_vm2 = vcmp.ge.f32.partialorder %v270_v60, 0.0  ;;  %v398_v4 = vmul.f32 0.1, %v270_v60  ;;  %vm335_vm3 = vcmp.ge.f32.partialorder %v271_v63, 0.0  ;;  %v399_v8 = vmul.f32 0.1, %v271_v63 }
  0x84   :  { %v1243_v42 = vld [vmem:[%s1631_s0 + $0xd0] sm:$0xff]   ;;  %v1244_v55 = vld [vmem:[%s1631_s0 + $0xd8] sm:$0xff]  }
  0x85   :  { %v1036_v54 = vunpack.c.l.bf16 %v1243_v42  ;;  %1270 = vst [vmem:[%s1634_s3 + $0xb0] sm:$0xff] %v1171_v47   ;;  %v1037_v58 = vunpack.c.h.bf16 %v1243_v42  ;;  %1271 = vst [vmem:[%s1634_s3 + $0xb8] sm:$0xff] %v1176_v51   ;;  %v1040_v2 = vunpack.c.l.bf16 %v1244_v55  ;;  %v462_v11 = vsel %vm334_vm2, %v270_v60, %v398_v4 }
  0x86   :  { %v1041_v13 = vunpack.c.h.bf16 %v1244_v55  ;;  %v463_v15 = vsel %vm335_vm3, %v271_v63, %v399_v8 }
  0x87   :  { %v201_v61 = vmul.f32 %v1036_v54, %v1306_v1  ;;  %v202_v0 = vmul.f32 %v1037_v58, %v1306_v1  ;;  %v203_v17 = vmul.f32 %v1040_v2, %v1306_v1  ;;  %v1186_v18 = vpack.c.bf16 %v463_v15, %v462_v11 }
  0x88   :  { %v204_v20 = vmul.f32 %v1041_v13, %v1306_v1 }
  0x89   :  { %v272_v5 = vadd.f32 %v1320_v7, %v201_v61  ;;  %v273_v9 = vadd.f32 %v1320_v7, %v202_v0  ;;  %v274_v23 = vadd.f32 %v1320_v7, %v203_v17 }
  0x8a   :  { %v275_v27 = vadd.f32 %v1320_v7, %v204_v20 }
  0x8b   :  { %vm336_vm4 = vcmp.ge.f32.partialorder %v272_v5, 0.0  ;;  %v400_v12 = vmul.f32 0.1, %v272_v5  ;;  %vm337_vm5 = vcmp.ge.f32.partialorder %v273_v9, 0.0  ;;  %v401_v16 = vmul.f32 0.1, %v273_v9 }
  0x8c   :  { %v1245_v10 = vld [vmem:[%s1631_s0 + $0xe0] sm:$0xff]   ;;  %v1246_v14 = vld [vmem:[%s1631_s0 + $0xe8] sm:$0xff]   ;;  %vm338_vm6 = vcmp.ge.f32.partialorder %v274_v23, 0.0  ;;  %v402_v31 = vmul.f32 0.1, %v274_v23  ;;  %vm339_vm7 = vcmp.ge.f32.partialorder %v275_v27, 0.0 }
  0x8d   :  { %1272 = vst [vmem:[%s1634_s3 + $0xc0] sm:$0xff] %v1181_v6   ;;  %v464_v19 = vsel %vm336_vm4, %v272_v5, %v400_v12  ;;  %v1044_v21 = vunpack.c.l.bf16 %v1245_v10  ;;  %v465_v22 = vsel %vm337_vm5, %v273_v9, %v401_v16  ;;  %v1045_v24 = vunpack.c.h.bf16 %v1245_v10  ;;  %1273 = vst [vmem:[%s1634_s3 + $0xc8] sm:$0xff] %v1186_v18  }
  0x8e   :  { %v1048_v25 = vunpack.c.l.bf16 %v1246_v14  ;;  %v1191_v26 = vpack.c.bf16 %v465_v22, %v464_v19  ;;  %v1049_v29 = vunpack.c.h.bf16 %v1246_v14  ;;  %v403_v34 = vmul.f32 0.1, %v275_v27 }
  0x8f   :  { %v205_v28 = vmul.f32 %v1044_v21, %v1306_v1  ;;  %v206_v32 = vmul.f32 %v1045_v24, %v1306_v1  ;;  %v466_v37 = vsel %vm338_vm6, %v274_v23, %v402_v31 }
  0x90   :  { %v207_v33 = vmul.f32 %v1048_v25, %v1306_v1  ;;  %v208_v36 = vmul.f32 %v1049_v29, %v1306_v1  ;;  %v467_v41 = vsel %vm339_vm7, %v275_v27, %v403_v34 }
  0x91   :  { %v276_v35 = vadd.f32 %v1320_v7, %v205_v28  ;;  %v277_v38 = vadd.f32 %v1320_v7, %v206_v32  ;;  %v1196_v45 = vpack.c.bf16 %v467_v41, %v466_v37 }
  0x92   :  { %v278_v39 = vadd.f32 %v1320_v7, %v207_v33  ;;  %v279_v43 = vadd.f32 %v1320_v7, %v208_v36 }
  0x93   :  { %vm340_vm8 = vcmp.ge.f32.partialorder %v276_v35, 0.0  ;;  %v404_v42 = vmul.f32 0.1, %v276_v35  ;;  %vm341_vm9 = vcmp.ge.f32.partialorder %v277_v38, 0.0  ;;  %v405_v46 = vmul.f32 0.1, %v277_v38 }
  0x94   :  { %v1247_v30 = vld [vmem:[%s1631_s0 + $0xf0] sm:$0xff]   ;;  %vm342_vm10 = vcmp.ge.f32.partialorder %v278_v39, 0.0  ;;  %vm343_vm11 = vcmp.ge.f32.partialorder %v279_v43, 0.0  ;;  %v406_v48 = vmul.f32 0.1, %v278_v39 }
  0x95   :  { %1274 = vst [vmem:[%s1634_s3 + $0xd0] sm:$0xff] %v1191_v26   ;;  %v1052_v40 = vunpack.c.l.bf16 %v1247_v30  ;;  %v468_v47 = vsel %vm340_vm8, %v276_v35, %v404_v42  ;;  %v407_v49 = vmul.f32 0.1, %v279_v43  ;;  %v469_v50 = vsel %vm341_vm9, %v277_v38, %v405_v46 }
  0x96   :  { %v1053_v51 = vunpack.c.h.bf16 %v1247_v30  ;;  %v1201_v54 = vpack.c.bf16 %v469_v50, %v468_v47  ;;  %v470_v55 = vsel %vm342_vm10, %v278_v39, %v406_v48 }
  0x97   :  { %v209_v52 = vmul.f32 %v1052_v40, %v1306_v1  ;;  %v471_v56 = vsel %vm343_vm11, %v279_v43, %v407_v49 }
  0x98   :  { %v1206_v58 = vpack.c.bf16 %v471_v56, %v470_v55  ;;  %v210_v59 = vmul.f32 %v1053_v51, %v1306_v1 }
  0x99   :  { %v280_v60 = vadd.f32 %v1320_v7, %v209_v52 }
  0x9a   :  { %v281_v63 = vadd.f32 %v1320_v7, %v210_v59 }
  0x9b   :  { %vm344_vm12 = vcmp.ge.f32.partialorder %v280_v60, 0.0  ;;  %v408_v0 = vmul.f32 0.1, %v280_v60 }
  0x9c   :  { %v1248_v44 = vld [vmem:[%s1631_s0 + $0xf8] sm:$0xff]   ;;  %vm345_vm13 = vcmp.ge.f32.partialorder %v281_v63, 0.0  ;;  %v409_v4 = vmul.f32 0.1, %v281_v63 }
  0x9d   :  { %1275 = vst [vmem:[%s1634_s3 + $0xd8] sm:$0xff] %v1196_v45   ;;  %v1056_v53 = vunpack.c.l.bf16 %v1248_v44  ;;  %v1057_v57 = vunpack.c.h.bf16 %v1248_v44  ;;  %1276 = vst [vmem:[%s1634_s3 + $0xe0] sm:$0xff] %v1201_v54   ;;  %v472_v5 = vsel %vm344_vm12, %v280_v60, %v408_v0 }
  0x9e   :  { %1277 = vst [vmem:[%s1634_s3 + $0xe8] sm:$0xff] %v1206_v58  }
  0x9f   :  { %v211_v61 = vmul.f32 %v1056_v53, %v1306_v1  ;;  %v212_v62 = vmul.f32 %v1057_v57, %v1306_v1  ;;  %v473_v1 = vsel %vm345_vm13, %v281_v63, %v409_v4 }
  0xa0   :  { %v1211_v9 = vpack.c.bf16 %v473_v1, %v472_v5 }
  0xa1   :  { %v282_v2 = vadd.f32 %v1320_v7, %v211_v61  ;;  %v283_v3 = vadd.f32 %v1320_v7, %v212_v62 }
  0xa2   :  { %1278 = vst [vmem:[%s1634_s3 + $0xf0] sm:$0xff] %v1211_v9  }
  0xa3   :  { %vm346_vm14 = vcmp.ge.f32.partialorder %v282_v2, 0.0  ;;  %vm347_vm15 = vcmp.ge.f32.partialorder %v283_v3, 0.0  ;;  %v410_v6 = vmul.f32 0.1, %v282_v2  ;;  %v411_v8 = vmul.f32 0.1, %v283_v3 }
  0xa5   :  { %v474_v10 = vsel %vm346_vm14, %v282_v2, %v410_v6  ;;  %v475_v11 = vsel %vm347_vm15, %v283_v3, %v411_v8 }
  0xa6   :  { %v1216_v12 = vpack.c.bf16 %v475_v11, %v474_v10 }
  0xa8   :  { %1279 = vst [vmem:[%s1634_s3 + $0xf8] sm:$0xff] %v1216_v12  }

</bundles_post_ra>
